<compile_context>
chip_gen: v5e
topology: v5e:2x2
jax: 0.10.0
libtpu: 0.0.40
codegen_flags: <defaults>
</compile_context>

<pallas_src>
import functools

import jax
import jax.numpy as jnp
from jax.experimental import pallas as pl
from jax.experimental.pallas import tpu as pltpu

_NEG_LARGE = -1e30  # "minus infinity" for padded logit columns (stays finite in f32)


def _match_prediction_kernel(x_ref, w_ref, b_ref, o_ref):
    # x_ref: (TM, H)   w_ref: (H, A_pad)   b_ref: (1, A_pad)   o_ref: (TM, A_pad)
    x = x_ref[...]
    w = w_ref[...]
    b = b_ref[...].astype(jnp.float32)

    # Linear: logits = x @ W + b  (MXU, f32 accumulate)
    logits = jnp.dot(x, w, preferred_element_type=jnp.float32) + b

    # Numerically stable log-softmax over the last (actionspace) axis, in f32.
    m = jnp.max(logits, axis=-1, keepdims=True)
    shifted = logits - m
    lse = jnp.log(jnp.sum(jnp.exp(shifted), axis=-1, keepdims=True))
    o_ref[...] = (shifted - lse).astype(o_ref.dtype)


def _round_up(v, m):
    return ((v + m - 1) // m) * m


@functools.partial(jax.jit, static_argnames=("tm",))
def match_prediction(x, weight, bias, *, tm=512):
    """
    x:      [batch, seq, hidden]               (f32 or bf16)
    weight: [hidden, actionspace]              (transpose of torch nn.Linear.weight)
    bias:   [actionspace]
    returns [batch, seq, actionspace] float32 log-probabilities
    """
    B, S, H = x.shape
    A = weight.shape[1]
    M = B * S

    # --- padding / tiling decisions -------------------------------------------------
    # Sublane multiple for the row axis (8 for 32-bit, 16 for 16-bit dtypes).
    row_mult = 8 if x.dtype.itemsize >= 4 else 16
    tm = max(row_mult, _round_up(min(tm, M), row_mult))
    M_pad = _round_up(M, tm)
    A_pad = _round_up(A, 128)  # lane-dense output / full MXU N

    x2d = x.reshape(M, H)
    if M_pad != M:
        x2d = jnp.pad(x2d, ((0, M_pad - M), (0, 0)))

    w_p = weight
    b_p = bias
    if A_pad != A:
        w_p = jnp.pad(weight, ((0, 0), (0, A_pad - A)))
        b_p = jnp.pad(bias, (0, A_pad - A), constant_values=_NEG_LARGE)
    b2d = b_p.reshape(1, A_pad)

    n_tiles = M_pad // tm

    grid_spec = pl.GridSpec(
        grid=(n_tiles,),
        in_specs=[
            pl.BlockSpec((tm, H), lambda i: (i, 0)),       # streamed x tile
            pl.BlockSpec((H, A_pad), lambda i: (0, 0)),    # resident weight
            pl.BlockSpec((1, A_pad), lambda i: (0, 0)),    # resident bias
        ],
        out_specs=pl.BlockSpec((tm, A_pad), lambda i: (i, 0)),
    )

    itemsize = x.dtype.itemsize
    cost = pl.CostEstimate(
        flops=2 * M_pad * H * A_pad,
        transcendentals=M_pad * A_pad,
        bytes_accessed=(M_pad * H + H * A_pad) * itemsize + M_pad * A_pad * 4,
    )

    out = pl.pallas_call(
        _match_prediction_kernel,
        out_shape=jax.ShapeDtypeStruct((M_pad, A_pad), jnp.float32),
        grid_spec=grid_spec,
        compiler_params=pltpu.CompilerParams(
            dimension_semantics=("parallel",),
        ),
        cost_estimate=cost,
    )(x2d, w_p, b2d)

    return out[:M, :A].reshape(B, S, A)


if __name__ == "__main__":
    # Small shapes consistent with the module: BERT hidden states [batch, seq, hidden]
    batch, seq, hidden, actionspace = 2, 8, 32, 16

    key = jax.random.PRNGKey(0)
    kx, kw, kb = jax.random.split(key, 3)

    x = jax.random.normal(kx, (batch, seq, hidden), dtype=jnp.float32)

    # Deterministic parameter init (mimics nn.Linear uniform(-1/sqrt(hidden), 1/sqrt(hidden)))
    bound = 1.0 / jnp.sqrt(jnp.float32(hidden))
    weight = jax.random.uniform(kw, (hidden, actionspace), jnp.float32, -bound, bound)
    bias = jax.random.uniform(kb, (actionspace,), jnp.float32, -bound, bound)

    out = match_prediction(x, weight, bias)
    out = jax.block_until_ready(out)

    # Reference check in plain JAX
    ref = jax.nn.log_softmax(x @ weight + bias, axis=-1)
    assert out.shape == (batch, seq, actionspace)
    assert jnp.allclose(out, ref, atol=1e-5, rtol=1e-5), "mismatch vs reference"

    print("KERNEL_OK")
</pallas_src>

<mosaic_0001>
module attributes {stable_mosaic.version = 11 : i64} {
  func.func @_match_prediction_kernel(%arg0: i32, %arg1: memref<16x32xf32, #tpu.memory_space<vmem>>, %arg2: memref<32x128xf32, #tpu.memory_space<vmem>>, %arg3: memref<1x128xf32, #tpu.memory_space<vmem>>, %arg4: memref<16x128xf32, #tpu.memory_space<vmem>>) attributes {dimension_semantics = [#tpu.dimension_semantics<parallel>], iteration_bounds = array<i64: 1>, scalar_prefetch = 0 : i64, scratch_operands = 0 : i64, tpu.core_type = #tpu.core_type<tc>, window_params = [{transform_indices = @transform_0, window_bounds = array<i64: 16, 32>}, {pipeline_mode = #tpu.pipeline_mode<synchronous>, transform_indices = @transform_1, window_bounds = array<i64: 32, 128>}, {pipeline_mode = #tpu.pipeline_mode<synchronous>, transform_indices = @transform_2, window_bounds = array<i64: 1, 128>}, {transform_indices = @transform_3, window_bounds = array<i64: 16, 128>}]} {
    %c0 = arith.constant 0 : index
    %c0_0 = arith.constant 0 : index
    %0 = vector.load %arg1[%c0, %c0_0] : memref<16x32xf32, #tpu.memory_space<vmem>>, vector<16x32xf32>
    %c0_1 = arith.constant 0 : index
    %c0_2 = arith.constant 0 : index
    %1 = vector.load %arg2[%c0_1, %c0_2] : memref<32x128xf32, #tpu.memory_space<vmem>>, vector<32x128xf32>
    %c0_3 = arith.constant 0 : index
    %c0_4 = arith.constant 0 : index
    %2 = vector.load %arg3[%c0_3, %c0_4] : memref<1x128xf32, #tpu.memory_space<vmem>>, vector<1x128xf32>
    %cst = arith.constant dense<0.000000e+00> : vector<16x128xf32>
    %3 = tpu.matmul %0, %1, %cst {dimension_numbers = #tpu.dot_dimension_numbers<[1], [0], [0], [1], [0, 0, 1, 1], [], []>} : vector<16x32xf32>, vector<32x128xf32>, vector<16x128xf32> -> vector<16x128xf32>
    %4 = vector.broadcast %2 : vector<1x128xf32> to vector<16x128xf32>
    %5 = arith.addf %3, %4 : vector<16x128xf32>
    %cst_5 = arith.constant dense<0xFF800000> : vector<16xf32>
    %6 = vector.multi_reduction <maximumf>, %5, %cst_5 [1] : vector<16x128xf32> to vector<16xf32>
    %7 = vector.shape_cast %6 : vector<16xf32> to vector<16x1xf32>
    %8 = vector.broadcast %7 : vector<16x1xf32> to vector<16x128xf32>
    %9 = arith.subf %5, %8 : vector<16x128xf32>
    %10 = math.exp %9 : vector<16x128xf32>
    %cst_6 = arith.constant dense<0.000000e+00> : vector<16xf32>
    %11 = vector.multi_reduction <add>, %10, %cst_6 [1] : vector<16x128xf32> to vector<16xf32>
    %12 = vector.shape_cast %11 : vector<16xf32> to vector<16x1xf32>
    %13 = math.log %12 : vector<16x1xf32>
    %14 = vector.broadcast %13 : vector<16x1xf32> to vector<16x128xf32>
    %15 = arith.subf %9, %14 : vector<16x128xf32>
    %c0_7 = arith.constant 0 : index
    %c0_8 = arith.constant 0 : index
    %16 = vector.load %arg4[%c0_7, %c0_8] : memref<16x128xf32, #tpu.memory_space<vmem>>, vector<16x128xf32>
    tpu.vector_store %arg4[%c0_7, %c0_8], %15 {strides = array<i32>} : memref<16x128xf32, #tpu.memory_space<vmem>>, vector<16x128xf32>,
    return
  }
  func.func @transform_0(%arg0: i32) -> (i32, i32) {
    %c0_i32 = arith.constant 0 : i32
    %c0_i32_0 = arith.constant 0 : i32
    return %arg0, %c0_i32 : i32, i32
  }
  func.func @transform_1(%arg0: i32) -> (i32, i32) {
    %c0_i32 = arith.constant 0 : i32
    %c0_i32_0 = arith.constant 0 : i32
    %c0_i32_1 = arith.constant 0 : i32
    return %c0_i32, %c0_i32_0 : i32, i32
  }
  func.func @transform_2(%arg0: i32) -> (i32, i32) {
    %c0_i32 = arith.constant 0 : i32
    %c0_i32_0 = arith.constant 0 : i32
    %c0_i32_1 = arith.constant 0 : i32
    return %c0_i32, %c0_i32_0 : i32, i32
  }
  func.func @transform_3(%arg0: i32) -> (i32, i32) {
    %c0_i32 = arith.constant 0 : i32
    %c0_i32_0 = arith.constant 0 : i32
    return %arg0, %c0_i32 : i32, i32
  }
}

</mosaic_0001>

<bundles_post_ra>
// kernel: match_prediction.1
= control target key start
LH: loop header
LB: loop body
LE: loop exit
PB: predicated region body
PF: predicated region fallthrough
CT: control target
= control target key end

     0   :  { %vm24_vm0 = vcmask 261120   ;;  %s142_s1 = inlined_call_operand.vmem [shape: f32[32,128], index: 1, kind: input, shape index: {}]   ;;  %s143_s2 = inlined_call_operand.vmem [shape: f32[1,128], index: 2, kind: input, shape index: {}]   ;;  %s144_s0 = inlined_call_operand.vmem [shape: f32[16,32], index: 0, kind: input, shape index: {}]   ;;  %s145_s3 = inlined_call_operand.vmem [shape: f32[16,128], index: 3, kind: output, shape index: {}]  }
   0x1   :  { %v19_v0 = vld [vmem:[%s142_s1 + $0x18] sm:$0xff]  ;;  %v18_v1 = vld [vmem:[%s142_s1 + $0x10] sm:$0xff]  ;;  %v17_v2 = vld [vmem:[%s142_s1 + $0x8] sm:$0xff] }
   0x2   :  { %43 = vmatpush.msra.mxu0 %v19_v0  ;;  %82 = vmatpush.msra.mxu1 %v19_v0  ;;  %v16_v3 = vld [vmem:[%s142_s1] sm:$0xff]  ;;  %v15_v5 = vld [vmem:[%s144_s0 + $0x8] sm:$0xff] }
   0x3   :  { %v14_v4 = vld [vmem:[%s144_s0] sm:$0xff] }
   0x4   :  { %44 = vmatpush.msra.mxu0 %v18_v1  ;;  %83 = vmatpush.msra.mxu1 %v18_v1  ;;  %v86_v6 = vld [vmem:[%s143_s2] ss:$0 sm:$0xff] }
   0x6   :  { %45 = vmatpush.msra.mxu0 %v17_v2  ;;  %84 = vmatpush.msra.mxu1 %v17_v2 }
   0x8   :  { %46 = vmatpush.msra.mxu0 %v16_v3  ;;  %85 = vmatpush.msra.mxu1 %v16_v3 }
   0x9   :  { %80 = vmatmul.msk.f32.vlgmr.msra.gmra.mxu0 %vm24_vm0, %v14_v4  ;;  %81 = vmatmul.msk.f32.vlgmr.msra.gmra.mxu1 %vm24_vm0, %v15_v5 }
  0x86   :  { %v48_v7 = vpop.f32.mrf.mxu0  ;;  %v51_v9 = vpop.f32.mrf.mxu1 }
  0x87   :  { %v49_v8 = vadd.f32 %v86_v6, %v48_v7  ;;  %v52_v10 = vadd.f32 %v86_v6, %v51_v9 }
  0x89   :  { %54 = vmax.xlane.f32.xlu0 %v49_v8 }
  0x91   :  { %56 = vmax.xlane.f32.xlu0 %v52_v10 }
  0xfc   :  { %v55_v11 = vpop.xlane.xlu0 %54 }
  0xfd   :  { %v58_v12 = vsub.f32 %v49_v8, %v55_v11 }
  0xff   :  { %v60_v13 = vmul.f32 1.442695, %v58_v12 }
 0x101   :  { %87 = vpow2.f32 %v60_v13 }
 0x104   :  { %v57_v14 = vpop.xlane.xlu0 %56 }
 0x105   :  { %v59_v15 = vsub.f32 %v52_v10, %v57_v14 }
 0x107   :  { %v88_v16 = vpop.eup %87  ;;  %v62_v17 = vmul.f32 1.442695, %v59_v15 }
 0x108   :  { %64 = vadd.xlane.f32.xlu1 %v88_v16 }
 0x109   :  { %89 = vpow2.f32 %v62_v17 }
 0x10f   :  { %v90_v18 = vpop.eup %89 }
 0x110   :  { %66 = vadd.xlane.f32.xlu1 %v90_v18 }
 0x17b   :  { %v65_v19 = vpop.xlane.xlu1 %64 }
 0x17c   :  { %91 = vlog2.f32 %v65_v19 }
 0x182   :  { %v92_v20 = vpop.eup %91 }
 0x183   :  { %v69_v21 = vmul.f32 0.6931472, %v92_v20  ;;  %v67_v22 = vpop.xlane.xlu1 %66 }
 0x184   :  { %93 = vlog2.f32 %v67_v22 }
 0x185   :  { %v72_v23 = vsub.f32 %v58_v12, %v69_v21 }
 0x187   :  { %74 = vst [vmem:[%s145_s3] sm:$0xff] %v72_v23 }
 0x18a   :  { %v94_v24 = vpop.eup %93 }
 0x18b   :  { %v71_v25 = vmul.f32 0.6931472, %v94_v24 }
 0x18d   :  { %v73_v26 = vsub.f32 %v59_v15, %v71_v25 }
 0x18f   :  { %75 = vst [vmem:[%s145_s3 + $0x8] sm:$0xff] %v73_v26 }

</bundles_post_ra>
